<compile_context>
chip_gen: v7x
topology: tpu7x:2x2x1
jax: 0.10.0
libtpu: 0.0.40
codegen_flags: <defaults>
</compile_context>

<pallas_src>
import functools

import jax
import jax.numpy as jnp
from jax.experimental import pallas as pl
from jax.experimental.pallas import tpu as pltpu


def _reward_mlp_kernel(x_ref, w1_ref, b1_ref, w2_ref, b2_ref, w3_ref, b3_ref,
                       o_ref, *, heads, hidden_size, fuse_l3):
    """One grid step = one batch tile; all heads fused inside the step."""
    x = x_ref[...]                                            # (TB, in) bf16

    # Layer 1: fused across heads -> one wide matmul (N = heads*hidden).
    h1 = jnp.dot(x, w1_ref[...], preferred_element_type=jnp.float32)
    h1 = jnp.maximum(h1 + b1_ref[...], 0.0).astype(x.dtype)   # (TB, H*hidden)

    # Layer 2: per-head (hidden, hidden) matmuls; heads is small -> static loop.
    h2_parts = []
    for h in range(heads):
        h1_h = h1[:, h * hidden_size:(h + 1) * hidden_size]
        a = jnp.dot(h1_h, w2_ref[h], preferred_element_type=jnp.float32)
        h2_parts.append(jnp.maximum(a + b2_ref[h], 0.0).astype(x.dtype))
    h2 = h2_parts[0] if heads == 1 else jnp.concatenate(h2_parts, axis=-1)

    # Layer 3.
    if fuse_l3:
        # Block-diagonal weights: one matmul emits the lane-dense output block.
        y = jnp.dot(h2, w3_ref[...], preferred_element_type=jnp.float32) + b3_ref[...]
    else:
        parts = []
        for h in range(heads):
            h2_h = h2[:, h * hidden_size:(h + 1) * hidden_size]
            parts.append(jnp.dot(h2_h, w3_ref[h],
                                 preferred_element_type=jnp.float32) + b3_ref[h])
        y = parts[0] if heads == 1 else jnp.concatenate(parts, axis=-1)

    # Final ReLU of the nn.Sequential, then ONE lane-dense store.
    o_ref[...] = jnp.maximum(y, 0.0).astype(o_ref.dtype)


def _round_up(x, m):
    return (x + m - 1) // m * m


def _vmem_budget_bytes():
    """~80% of physical per-core VMEM (leaves compiler-scratch headroom)."""
    try:
        cap = pltpu.get_tpu_info().vmem_capacity_bytes
    except Exception:
        cap = 64 * 1024 * 1024          # conservative (v7x-sized) fallback
    return int(0.8 * cap)


def _choose_batch_tile(batch, row_bytes, io_budget):
    """Largest tile fitting the per-row IO/activation budget, capped so the
    'parallel' batch grid has >=2 steps (v7x megacore) when batch allows."""
    if batch >= 16:
        two_step_cap = _round_up(pl.cdiv(batch, 2), 8)
    else:
        two_step_cap = _round_up(max(batch, 1), 8)
    for t in (1024, 512, 256, 128, 64, 32, 16, 8):
        if t <= two_step_cap and t * row_bytes <= io_budget:
            return t
    return 8


def reward_mlp(x, params, *, compute_dtype=jnp.bfloat16):
    """x: (B, input_size). params: stacked per-head weights (see init_params).

    compute_dtype feeds the MXU (bf16 by default; every dot accumulates in f32
    and biases stay f32). Pass jnp.float32 if reward scores are drift-sensitive.
    """
    w1, b1, w2, b2, w3, b3 = (params["w1"], params["b1"], params["w2"],
                              params["b2"], params["w3"], params["b3"])
    heads, input_size, hidden_size = w1.shape
    output_size = w3.shape[-1]
    B = x.shape[0]
    out_dtype = x.dtype
    out_width = heads * output_size

    cbytes = jnp.dtype(compute_dtype).itemsize
    obytes = jnp.dtype(out_dtype).itemsize

    # Fuse layer 3 across heads (block-diagonal weights) when the blow-up is
    # small -- output_size is tiny for reward heads, so this is the norm.
    fuse_l3 = heads * hidden_size * out_width * cbytes <= 8 * 1024 * 1024

    # ---- wrapper-side weight prep (bf16 MXU feeds, f32 biases) -------------
    w1_all = jnp.transpose(w1, (1, 0, 2)).reshape(input_size, heads * hidden_size)
    w1_all = w1_all.astype(compute_dtype)
    b1_all = b1[:, 0, :].reshape(1, heads * hidden_size).astype(jnp.float32)
    w2c = w2.astype(compute_dtype)                           # (H, hidden, hidden)
    b2f = b2.astype(jnp.float32)                             # (H, 1, hidden)

    if fuse_l3:
        w3k = jnp.zeros((heads * hidden_size, out_width), dtype=compute_dtype)
        for h in range(heads):
            w3k = w3k.at[h * hidden_size:(h + 1) * hidden_size,
                         h * output_size:(h + 1) * output_size].set(
                             w3[h].astype(compute_dtype))
        b3k = b3[:, 0, :].reshape(1, out_width).astype(jnp.float32)
        w3_spec = pl.BlockSpec((heads * hidden_size, out_width),
                               lambda b: (0, 0), pipeline_mode=pl.Buffered(1))
        b3_spec = pl.BlockSpec((1, out_width), lambda b: (0, 0),
                               pipeline_mode=pl.Buffered(1))
    else:
        w3k = w3.astype(compute_dtype)                       # (H, hidden, out)
        b3k = b3.astype(jnp.float32)                         # (H, 1, out)
        w3_spec = pl.BlockSpec((heads, hidden_size, output_size),
                               lambda b: (0, 0, 0), pipeline_mode=pl.Buffered(1))
        b3_spec = pl.BlockSpec((heads, 1, output_size), lambda b: (0, 0, 0),
                               pipeline_mode=pl.Buffered(1))

    # ---- VMEM budget: weights counted once (single-buffered), IO x2 --------
    budget = _vmem_budget_bytes()
    w_bytes = (w1_all.size + w2c.size + w3k.size) * cbytes
    b_bytes = (b1_all.size + b2f.size + b3k.size) * 4
    weights_resident = w_bytes + b_bytes
    io_row = 2 * (input_size * cbytes + out_width * obytes)   # double-buffered
    act_row = 4 * heads * hidden_size * 4                     # f32 temporaries
    row_bytes = io_row + act_row
    io_budget = max(budget - weights_resident, 8 * row_bytes)
    tb = _choose_batch_tile(B, row_bytes, io_budget)

    vmem_need = weights_resident + tb * row_bytes
    vmem_limit = int(min(budget, max(32 * 1024 * 1024, int(vmem_need * 1.25))))

    # ---- pad batch to a tile multiple (no tb=B fallback) --------------------
    B_pad = _round_up(B, tb)
    xc = x.astype(compute_dtype)
    if B_pad != B:
        xc = jnp.pad(xc, ((0, B_pad - B), (0, 0)))
    grid = (B_pad // tb,)

    kernel = functools.partial(_reward_mlp_kernel, heads=heads,
                               hidden_size=hidden_size, fuse_l3=fuse_l3)

    out = pl.pallas_call(
        kernel,
        out_shape=jax.ShapeDtypeStruct((B_pad, out_width), out_dtype),
        grid_spec=pltpu.PrefetchScalarGridSpec(
            num_scalar_prefetch=0,
            grid=grid,
            in_specs=[
                # batch tile of activations (double-buffered by the pipeline)
                pl.BlockSpec((tb, input_size), lambda b: (b, 0)),
                # fused / stacked weights & biases: constant block, fetched
                # once, single-buffered (they never change block index)
                pl.BlockSpec((input_size, heads * hidden_size),
                             lambda b: (0, 0), pipeline_mode=pl.Buffered(1)),
                pl.BlockSpec((1, heads * hidden_size), lambda b: (0, 0),
                             pipeline_mode=pl.Buffered(1)),
                pl.BlockSpec((heads, hidden_size, hidden_size),
                             lambda b: (0, 0, 0), pipeline_mode=pl.Buffered(1)),
                pl.BlockSpec((heads, 1, hidden_size), lambda b: (0, 0, 0),
                             pipeline_mode=pl.Buffered(1)),
                w3_spec,
                b3_spec,
            ],
            out_specs=pl.BlockSpec((tb, out_width), lambda b: (b, 0)),
        ),
        compiler_params=pltpu.CompilerParams(
            dimension_semantics=("parallel",),
            vmem_limit_bytes=vmem_limit,
        ),
    )(xc, w1_all, b1_all, w2c, b2f, w3k, b3k)

    # Already in torch.cat(dim=1) layout; just drop the batch padding.
    return out[:B]


def init_params(key, heads, input_size, hidden_size, output_size,
                dtype=jnp.float32):
    """Deterministic synthetic init (uniform, PyTorch-Linear-like scale)."""
    ks = jax.random.split(key, 6)

    def unif(k, shape, fan_in):
        bound = 1.0 / (fan_in ** 0.5)
        return jax.random.uniform(k, shape, dtype, minval=-bound, maxval=bound)

    return {
        "w1": unif(ks[0], (heads, input_size, hidden_size), input_size),
        "b1": unif(ks[1], (heads, 1, hidden_size), input_size),
        "w2": unif(ks[2], (heads, hidden_size, hidden_size), hidden_size),
        "b2": unif(ks[3], (heads, 1, hidden_size), hidden_size),
        "w3": unif(ks[4], (heads, hidden_size, output_size), hidden_size),
        "b3": unif(ks[5], (heads, 1, output_size), hidden_size),
    }


def reward_mlp_ref(x, params):
    """Pure-JAX f32 reference matching the PyTorch module semantics."""
    outs = []
    for h in range(params["w1"].shape[0]):
        a = jnp.maximum(x @ params["w1"][h] + params["b1"][h, 0], 0.0)
        a = jnp.maximum(a @ params["w2"][h] + params["b2"][h, 0], 0.0)
        a = jnp.maximum(a @ params["w3"][h] + params["b3"][h, 0], 0.0)
        outs.append(a)
    return jnp.concatenate(outs, axis=1)


if __name__ == "__main__":
    key = jax.random.PRNGKey(0)
    k_x, k_p = jax.random.split(key)

    batch, input_size, hidden_size, output_size, heads = 4, 16, 32, 8, 2

    x = jax.random.normal(k_x, (batch, input_size), dtype=jnp.float32)
    params = init_params(k_p, heads, input_size, hidden_size, output_size)

    out = reward_mlp(x, params)
    out = jax.block_until_ready(out)

    ref = reward_mlp_ref(x, params)
    assert out.shape == (batch, heads * output_size), out.shape
    # bf16 MXU feeds vs f32 reference: relaxed tolerance.
    assert jnp.allclose(out, ref, atol=2e-2, rtol=2e-2), "mismatch vs reference"

    print("KERNEL_OK")
</pallas_src>

<mosaic_0001>
module attributes {stable_mosaic.version = 11 : i64} {
  func.func @_reward_mlp_kernel(%arg0: i32, %arg1: memref<8x16xbf16, #tpu.memory_space<vmem>>, %arg2: memref<16x64xbf16, #tpu.memory_space<vmem>>, %arg3: memref<1x64xf32, #tpu.memory_space<vmem>>, %arg4: memref<2x32x32xbf16, #tpu.memory_space<vmem>>, %arg5: memref<2x1x32xf32, #tpu.memory_space<vmem>>, %arg6: memref<64x16xbf16, #tpu.memory_space<vmem>>, %arg7: memref<1x16xf32, #tpu.memory_space<vmem>>, %arg8: memref<8x16xf32, #tpu.memory_space<vmem>>) attributes {dimension_semantics = [#tpu.dimension_semantics<parallel>], iteration_bounds = array<i64: 1>, scalar_prefetch = 0 : i64, scratch_operands = 0 : i64, tpu.core_type = #tpu.core_type<tc>, window_params = [{transform_indices = @transform_0, window_bounds = array<i64: 8, 16>}, {pipeline_mode = #tpu.pipeline_mode<synchronous>, transform_indices = @transform_1, window_bounds = array<i64: 16, 64>}, {pipeline_mode = #tpu.pipeline_mode<synchronous>, transform_indices = @transform_2, window_bounds = array<i64: 1, 64>}, {pipeline_mode = #tpu.pipeline_mode<synchronous>, transform_indices = @transform_3, window_bounds = array<i64: 2, 32, 32>}, {pipeline_mode = #tpu.pipeline_mode<synchronous>, transform_indices = @transform_4, window_bounds = array<i64: 2, 1, 32>}, {pipeline_mode = #tpu.pipeline_mode<synchronous>, transform_indices = @transform_5, window_bounds = array<i64: 64, 16>}, {pipeline_mode = #tpu.pipeline_mode<synchronous>, transform_indices = @transform_6, window_bounds = array<i64: 1, 16>}, {transform_indices = @transform_7, window_bounds = array<i64: 8, 16>}]} {
    %c0 = arith.constant 0 : index
    %c0_0 = arith.constant 0 : index
    %0 = vector.load %arg1[%c0, %c0_0] : memref<8x16xbf16, #tpu.memory_space<vmem>>, vector<8x16xbf16>
    %c0_1 = arith.constant 0 : index
    %c0_2 = arith.constant 0 : index
    %1 = vector.load %arg2[%c0_1, %c0_2] : memref<16x64xbf16, #tpu.memory_space<vmem>>, vector<16x64xbf16>
    %cst = arith.constant dense<0.000000e+00> : vector<8x64xf32>
    %2 = tpu.matmul %0, %1, %cst {dimension_numbers = #tpu.dot_dimension_numbers<[1], [0], [0], [1], [0, 0, 1, 1], [], []>} : vector<8x16xbf16>, vector<16x64xbf16>, vector<8x64xf32> -> vector<8x64xf32>
    %c0_3 = arith.constant 0 : index
    %c0_4 = arith.constant 0 : index
    %3 = vector.load %arg3[%c0_3, %c0_4] : memref<1x64xf32, #tpu.memory_space<vmem>>, vector<1x64xf32>
    %4 = vector.broadcast %3 : vector<1x64xf32> to vector<8x64xf32>
    %5 = arith.addf %2, %4 : vector<8x64xf32>
    %cst_5 = arith.constant 0.000000e+00 : f32
    %6 = vector.broadcast %cst_5 : f32 to vector<8x64xf32>
    %7 = arith.maximumf %5, %6 : vector<8x64xf32>
    %8 = arith.truncf %7 : vector<8x64xf32> to vector<8x64xbf16>
    %9 = vector.extract_strided_slice %8 {offsets = [0, 0], sizes = [8, 32], strides = [1, 1]} : vector<8x64xbf16> to vector<8x32xbf16>
    %c0_6 = arith.constant 0 : index
    %c0_7 = arith.constant 0 : index
    %c0_8 = arith.constant 0 : index
    %10 = vector.load %arg4[%c0_6, %c0_7, %c0_8] : memref<2x32x32xbf16, #tpu.memory_space<vmem>>, vector<1x32x32xbf16>
    %11 = vector.shape_cast %10 : vector<1x32x32xbf16> to vector<32x32xbf16>
    %cst_9 = arith.constant dense<0.000000e+00> : vector<8x32xf32>
    %12 = tpu.matmul %9, %11, %cst_9 {dimension_numbers = #tpu.dot_dimension_numbers<[1], [0], [0], [1], [0, 0, 1, 1], [], []>} : vector<8x32xbf16>, vector<32x32xbf16>, vector<8x32xf32> -> vector<8x32xf32>
    %c0_10 = arith.constant 0 : index
    %c0_11 = arith.constant 0 : index
    %c0_12 = arith.constant 0 : index
    %13 = vector.load %arg5[%c0_10, %c0_11, %c0_12] : memref<2x1x32xf32, #tpu.memory_space<vmem>>, vector<1x1x32xf32>
    %14 = vector.shape_cast %13 : vector<1x1x32xf32> to vector<1x32xf32>
    %15 = vector.broadcast %14 : vector<1x32xf32> to vector<8x32xf32>
    %16 = arith.addf %12, %15 : vector<8x32xf32>
    %cst_13 = arith.constant 0.000000e+00 : f32
    %17 = vector.broadcast %cst_13 : f32 to vector<8x32xf32>
    %18 = arith.maximumf %16, %17 : vector<8x32xf32>
    %19 = arith.truncf %18 : vector<8x32xf32> to vector<8x32xbf16>
    %20 = vector.extract_strided_slice %8 {offsets = [0, 32], sizes = [8, 32], strides = [1, 1]} : vector<8x64xbf16> to vector<8x32xbf16>
    %c1 = arith.constant 1 : index
    %c0_14 = arith.constant 0 : index
    %c0_15 = arith.constant 0 : index
    %21 = vector.load %arg4[%c1, %c0_14, %c0_15] : memref<2x32x32xbf16, #tpu.memory_space<vmem>>, vector<1x32x32xbf16>
    %22 = vector.shape_cast %21 : vector<1x32x32xbf16> to vector<32x32xbf16>
    %cst_16 = arith.constant dense<0.000000e+00> : vector<8x32xf32>
    %23 = tpu.matmul %20, %22, %cst_16 {dimension_numbers = #tpu.dot_dimension_numbers<[1], [0], [0], [1], [0, 0, 1, 1], [], []>} : vector<8x32xbf16>, vector<32x32xbf16>, vector<8x32xf32> -> vector<8x32xf32>
    %c1_17 = arith.constant 1 : index
    %c0_18 = arith.constant 0 : index
    %c0_19 = arith.constant 0 : index
    %24 = vector.load %arg5[%c1_17, %c0_18, %c0_19] : memref<2x1x32xf32, #tpu.memory_space<vmem>>, vector<1x1x32xf32>
    %25 = vector.shape_cast %24 : vector<1x1x32xf32> to vector<1x32xf32>
    %26 = vector.broadcast %25 : vector<1x32xf32> to vector<8x32xf32>
    %27 = arith.addf %23, %26 : vector<8x32xf32>
    %cst_20 = arith.constant 0.000000e+00 : f32
    %28 = vector.broadcast %cst_20 : f32 to vector<8x32xf32>
    %29 = arith.maximumf %27, %28 : vector<8x32xf32>
    %30 = arith.truncf %29 : vector<8x32xf32> to vector<8x32xbf16>
    %31 = tpu.concatenate %19, %30 in 1 : vector<8x32xbf16>, vector<8x32xbf16> -> vector<8x64xbf16>
    %c0_21 = arith.constant 0 : index
    %c0_22 = arith.constant 0 : index
    %32 = vector.load %arg6[%c0_21, %c0_22] : memref<64x16xbf16, #tpu.memory_space<vmem>>, vector<64x16xbf16>
    %cst_23 = arith.constant dense<0.000000e+00> : vector<8x16xf32>
    %33 = tpu.matmul %31, %32, %cst_23 {dimension_numbers = #tpu.dot_dimension_numbers<[1], [0], [0], [1], [0, 0, 1, 1], [], []>} : vector<8x64xbf16>, vector<64x16xbf16>, vector<8x16xf32> -> vector<8x16xf32>
    %c0_24 = arith.constant 0 : index
    %c0_25 = arith.constant 0 : index
    %34 = vector.load %arg7[%c0_24, %c0_25] : memref<1x16xf32, #tpu.memory_space<vmem>>, vector<1x16xf32>
    %35 = vector.broadcast %34 : vector<1x16xf32> to vector<8x16xf32>
    %36 = arith.addf %33, %35 : vector<8x16xf32>
    %cst_26 = arith.constant 0.000000e+00 : f32
    %37 = vector.broadcast %cst_26 : f32 to vector<8x16xf32>
    %38 = arith.maximumf %36, %37 : vector<8x16xf32>
    %c0_27 = arith.constant 0 : index
    %c0_28 = arith.constant 0 : index
    %39 = vector.load %arg8[%c0_27, %c0_28] : memref<8x16xf32, #tpu.memory_space<vmem>>, vector<8x16xf32>
    tpu.vector_store %arg8[%c0_27, %c0_28], %38 {strides = array<i32>} : memref<8x16xf32, #tpu.memory_space<vmem>>, vector<8x16xf32>,
    return
  }
  func.func @transform_0(%arg0: i32) -> (i32, i32) {
    %c0_i32 = arith.constant 0 : i32
    %c0_i32_0 = arith.constant 0 : i32
    return %arg0, %c0_i32 : i32, i32
  }
  func.func @transform_1(%arg0: i32) -> (i32, i32) {
    %c0_i32 = arith.constant 0 : i32
    %c0_i32_0 = arith.constant 0 : i32
    %c0_i32_1 = arith.constant 0 : i32
    return %c0_i32, %c0_i32_0 : i32, i32
  }
  func.func @transform_2(%arg0: i32) -> (i32, i32) {
    %c0_i32 = arith.constant 0 : i32
    %c0_i32_0 = arith.constant 0 : i32
    %c0_i32_1 = arith.constant 0 : i32
    return %c0_i32, %c0_i32_0 : i32, i32
  }
  func.func @transform_3(%arg0: i32) -> (i32, i32, i32) {
    %c0_i32 = arith.constant 0 : i32
    %c0_i32_0 = arith.constant 0 : i32
    %c0_i32_1 = arith.constant 0 : i32
    %c0_i32_2 = arith.constant 0 : i32
    return %c0_i32, %c0_i32_0, %c0_i32_1 : i32, i32, i32
  }
  func.func @transform_4(%arg0: i32) -> (i32, i32, i32) {
    %c0_i32 = arith.constant 0 : i32
    %c0_i32_0 = arith.constant 0 : i32
    %c0_i32_1 = arith.constant 0 : i32
    %c0_i32_2 = arith.constant 0 : i32
    return %c0_i32, %c0_i32_0, %c0_i32_1 : i32, i32, i32
  }
  func.func @transform_5(%arg0: i32) -> (i32, i32) {
    %c0_i32 = arith.constant 0 : i32
    %c0_i32_0 = arith.constant 0 : i32
    %c0_i32_1 = arith.constant 0 : i32
    return %c0_i32, %c0_i32_0 : i32, i32
  }
  func.func @transform_6(%arg0: i32) -> (i32, i32) {
    %c0_i32 = arith.constant 0 : i32
    %c0_i32_0 = arith.constant 0 : i32
    %c0_i32_1 = arith.constant 0 : i32
    return %c0_i32, %c0_i32_0 : i32, i32
  }
  func.func @transform_7(%arg0: i32) -> (i32, i32) {
    %c0_i32 = arith.constant 0 : i32
    %c0_i32_0 = arith.constant 0 : i32
    return %arg0, %c0_i32 : i32, i32
  }
}

</mosaic_0001>

<bundles_post_ra>
// kernel: tpu_custom_call.1
= control target key start
LH: loop header
LB: loop body
LE: loop exit
PB: predicated region body
PF: predicated region fallthrough
CT: control target
= control target key end

     0   :  { %v443_v1 = vmov 0.0   ;;  %vm44_vm0 = vcmask 130048   ;;  %vm444_vm1 = vmmov 0   ;;  %s551_s0 = inlined_call_operand.vmem [shape: bf16[8,16], index: 0, kind: input, shape index: {}]   ;;  %s552_s1 = inlined_call_operand.vmem [shape: bf16[16,64], index: 1, kind: input, shape index: {}]   ;;  %s553_s2 = inlined_call_operand.vmem [shape: f32[1,64], index: 2, kind: input, shape index: {}]   ;;  %s554_s3 = inlined_call_operand.vmem [shape: bf16[2,32,32], index: 3, kind: input, shape index: {}]   ;;  %s555_s4 = inlined_call_operand.vmem [shape: f32[2,1,32], index: 4, kind: input, shape index: {}]   ;;  %s556_s5 = inlined_call_operand.vmem [shape: bf16[64,16], index: 5, kind: input, shape index: {}]   ;;  %s557_s6 = inlined_call_operand.vmem [shape: f32[1,16], index: 6, kind: input, shape index: {}]   ;;  %s558_s7 = inlined_call_operand.hbm [shape: f32[8,16], index: 7, kind: output, shape index: {}]  }
   0x1   :  { %v410_v0 = vld [vmem:[%s552_s1] sm:$0xff]   ;;  %371 = vmatprep.subr.bf16.mxu0 %v443_v1  ;;  %393 = vmatprep.subr.bf16.mxu1 %v443_v1 }
   0x2   :  { %v28_v2 = vld [vmem:[%s551_s0] sm:$0xf]  ;;  %372 = vmatpush3.bf16.msra.mxu0 %v410_v0  ;;  %373 = vmatprep.mubr.msk.bf16.mxu0 %vm444_vm1, %v443_v1 }
   0x3   :  { %377 = vmatprep.subr.bf16.mxu0 %v443_v1  ;;  %401 = vmatprep.mubr.msk.bf16.mxu1 %vm444_vm1, %v443_v1 }
   0x5   :  { %374 = vmatmul.mubr.msk.bf16.vlgmr.msra.gmra.mrb[0].mxu0 %vm44_vm0, %v28_v2 }
   0x6   :  { %381 = vmatprep.mubr.msk.bf16.mxu0 %vm444_vm1, %v443_v1 }
   0x7   :  { %12 = vsyncpa [#allocation3], 0  ;;  %v411_v3 = vld [vmem:[%s554_s3] sm:$0xff]   ;;  %v412_v4 = vld [vmem:[%s554_s3 + $0x8] sm:$0xff]   ;;  %vm113_vm2 = vcmask 261120   ;;  %s445_s11 = smov 96  }
   0x8   :  { %378 = vmatpush3.bf16.msra.mxu0 %v411_v3  ;;  %v336_v5 = vld [vmem:[%s553_s2] ss:$0 sm:$0xff]  ;;  %v413_v12 = vld [vmem:[%s554_s3 + $0x10] sm:$0xff]   ;;  %v414_v14 = vld [vmem:[%s554_s3 + $0x18] sm:$0xff]   ;;  %s446_s22 = smov 32   ;;  %vm277_vm3 = vcmask 523264  }
   0x9   :  { %379 = vmatprep.subr.bf16.mxu0 %v443_v1  ;;  %v415_v16 = vld [vmem:[%s556_s5] sm:$0xff]   ;;  %v416_v17 = vld [vmem:[%s556_s5 + $0x8] sm:$0xff]   ;;  %v417_v19 = vld [vmem:[%s556_s5 + $0x10] sm:$0xff]   ;;  %s447_s26 = smov [#allocation2]  }
   0xa   :  { %394 = vmatpush3.bf16.msra.mxu1 %v415_v16  ;;  %v418_v23 = vld [vmem:[%s556_s5 + $0x18] sm:$0xff]   ;;  %v348_v24 = vld [vmem:[%s555_s4 + $0x1] ss:$0 sm:$0xff]  ;;  %v339_v32 = vld [vmem:[%s555_s4] ss:$0 sm:$0xff]  ;;  %s328_s27 = sshll.u32 %s447_s26, 4  ;;  %s329_s27 = int_to_ptr.vmem [resolvable:$true] %s328_s27 }
   0xb   :  { %395 = vmatprep.subr.bf16.mxu1 %v443_v1  ;;  %v352_v38 = vld [vmem:[%s557_s6] ss:$0 sm:$0xff]  ;;  %s419_s4 = scalar_lea.vmem %s329_s27, 128  ;;  %p424_p1 = scmp.lt.s32.totalorder %s329_s27, %s329_s27 }
   0xc   :  { %380 = vmatpush3.bf16.msra.mxu0 %v412_v4  ;;  %p420_p0 = scmp.ne.s32.totalorder %s329_s27, %s419_s4  ;;  %p425_p2 = scmp.lt.s32.totalorder %s419_s4, %s419_s4 }
   0xd   :  { %385 = vmatprep.subr.bf16.mxu0 %v443_v1 }
   0xe   :  { %396 = vmatpush3.bf16.msra.mxu1 %v416_v17  ;;  %p426_p3 = por %p425_p2, %p424_p1 }
   0xf   :  { %397 = vmatprep.subr.bf16.mxu1 %v443_v1 }
  0x10   :  { %p427_p4 = pnand %p426_p3, %p420_p0 }
  0x12   :  { %398 = vmatpush3.bf16.msra.mxu1 %v417_v19 }
  0x13   :  { %399 = vmatprep.subr.bf16.mxu1 %v443_v1 }
  0x16   :  { %400 = vmatpush3.bf16.msra.mxu1 %v418_v23 }
  0xd8   :  { %v82_v6 = vpop.f32.mrb[0].mxu0 }
  0xd9   :  { %v83_v7 = vadd.f32 %v336_v5, %v82_v6  ;;  %v375_v8 = vpop.f32.mrb[1].mxu0 }
  0xda   :  { %v85_v9 = vpop.f32.mrb[2].mxu0 }
  0xdb   :  { %v88_v10 = vmax.f32 %v83_v7, 0.0  ;;  %v376_v11 = vpop.f32.mrb[3].mxu0 }
  0xdd   :  { %v89_v13 = vpack.c.bf16 %v88_v10, %v88_v10 }
  0xdf   :  { %173 = vrot.lane.b32.xlu0 %v89_v13, %s445_s11  ;;  %382 = vmatmul.mubr.msk.bf16.vlgmr.msra.gmra.mrb[4].mxu0 %vm113_vm2, %v89_v13 }
  0xe0   :  { %386 = vmatpush3.bf16.msra.mxu0 %v413_v12  ;;  %389 = vmatprep.mubr.msk.bf16.mxu0 %vm444_vm1, %v443_v1 }
  0xe1   :  { %387 = vmatprep.subr.bf16.mxu0 %v443_v1 }
  0xe4   :  { %388 = vmatpush3.bf16.msra.mxu0 %v414_v14 }
 0x151   :  { %v174_v15 = vpop.permute.xlu0 %173 }
 0x152   :  { %390 = vmatmul.mubr.msk.bf16.vlgmr.msra.gmra.mrb[8].mxu0 %vm113_vm2, %v174_v15 }
 0x1b2   :  { %v151_v18 = vpop.f32.mrb[4].mxu0 }
 0x1b3   :  { %v383_v20 = vpop.f32.mrb[5].mxu0  ;;  %v152_v33 = vadd.f32 %v339_v32, %v151_v18 }
 0x1b4   :  { %v154_v21 = vpop.f32.mrb[6].mxu0 }
 0x1b5   :  { %v384_v22 = vpop.f32.mrb[7].mxu0  ;;  %v157_v34 = vmax.f32 %v152_v33, 0.0 }
 0x1b7   :  { %v158_v35 = vpack.c.bf16 %v157_v34, %v157_v34 }
 0x225   :  { %v224_v25 = vpop.f32.mrb[8].mxu0 }
 0x226   :  { %v225_v26 = vadd.f32 %v348_v24, %v224_v25  ;;  %v391_v27 = vpop.f32.mrb[9].mxu0 }
 0x227   :  { %v227_v28 = vpop.f32.mrb[10].mxu0 }
 0x228   :  { %v230_v29 = vmax.f32 %v225_v26, 0.0  ;;  %v392_v30 = vpop.f32.mrb[11].mxu0 }
 0x22a   :  { %v231_v31 = vpack.c.bf16 %v230_v29, %v230_v29 }
 0x22c   :  { %233 = vrot.lane.b32.xlu0 %v231_v31, %s446_s22 }
 0x29e   :  { %v234_v36 = vpop.permute.xlu0 %233 }
 0x29f   :  { %v237_v37 = vsel %vm113_vm2, %v158_v35, %v234_v36 }
 0x2a0   :  { %402 = vmatmul.mubr.msk.bf16.vlgmr.msra.gmra.mrb[0].mxu1 %vm277_vm3, %v237_v37 }
 0x373   :  { %v314_v39 = vpop.f32.mrb[0].mxu1 }
 0x374   :  { %v315_v40 = vadd.f32 %v352_v38, %v314_v39  ;;  %v403_v41 = vpop.f32.mrb[1].mxu1 }
 0x375   :  { %v317_v42 = vpop.f32.mrb[2].mxu1 }
 0x376   :  { %v320_v43 = vmax.f32 %v315_v40, 0.0  ;;  %v404_v44 = vpop.f32.mrb[3].mxu1 }
 0x378   :  { %321 = vst.msk [vmem:[#allocation2] sm:$0xff] %vm44_vm0, %v320_v43 }
 0x379   :  { %430 = shalt.err (!%p427_p4)
}
 0x37a   :  { %s431_s28 = scalar_lea.hbm %s558_s7, 128 }
 0x37b   :  { %p432_p5 = scmp.ne.s32.totalorder %s558_s7, %s431_s28  ;;  %p435_p6 = scmp.lt.u32.totalorder %s431_s28, %s558_s7 }
 0x37d   :  { %p437_p7 = pnand %p435_p6, %p432_p5 }
 0x37f   :  { %440 = shalt.err (!%p437_p7)
}
 0x380   :  { %331 = dma.vmem_to_hbm [thread:$0]  %s329_s27, 128, %s558_s7, [#allocation3]  }
 0x381   :  { %441 = dma.done.wait [#allocation3], 128  }
 0x382   :  { %442 = vsyncadd [#allocation3], 4294967168 }
 0x383   :  { %335 = vsyncpa [#allocation3], 1 }

</bundles_post_ra>
